<compile_context>
chip_gen: v7x
topology: tpu7x:2x2x1
jax: 0.10.0
libtpu: 0.0.40
codegen_flags: <defaults>
</compile_context>

<pallas_src>
import jax
import jax.numpy as jnp
from jax.experimental import pallas as pl
from jax.experimental.pallas import tpu as pltpu


_VMEM_BUDGET = 28 * 1024 * 1024   # working-set target (double-buffered tiles)
_VMEM_LIMIT = 32 * 1024 * 1024    # safe scoped limit on v5e / v6e / v7x


def _round_up(x, m):
    return ((x + m - 1) // m) * m


# --------------------------- kernels ----------------------------------------

def _linear_kernel_fused(x_ref, w_ref, b_ref, o_ref):
    # Whole K in one block: y = x @ w + b   (bias add in f32, no scratch).
    acc = jnp.dot(x_ref[...], w_ref[...], preferred_element_type=jnp.float32)
    o_ref[...] = (acc + b_ref[...]).astype(o_ref.dtype)


def _linear_kernel_ktiled(x_ref, w_ref, b_ref, o_ref, acc_ref):
    # Fallback for very large dim_in: K reduction with f32 VMEM accumulator.
    k = pl.program_id(2)

    @pl.when(k == 0)
    def _():
        acc_ref[...] = jnp.zeros_like(acc_ref)

    acc_ref[...] += jnp.dot(x_ref[...], w_ref[...],
                            preferred_element_type=jnp.float32)

    @pl.when(k == pl.num_programs(2) - 1)
    def _():
        o_ref[...] = (acc_ref[...] + b_ref[...]).astype(o_ref.dtype)


# --------------------------- tile selection ----------------------------------

def _select_tiles(B, Kp, Np, in_itemsize, out_itemsize):
    """Returns (tile_b, tn, tk). tk == Kp means the fused single-K kernel."""
    # N tile: whole padded output if modest, else 256/128 lane-dense slices.
    if Np <= 512:
        tn = Np
    elif Np % 256 == 0:
        tn = 256
    else:
        tn = 128
    n_tiles_n = Np // tn

    Bp0 = _round_up(B, 8)
    cands = [t for t in (1024, 512, 256, 128, 64, 32, 16, 8) if t <= Bp0]
    if not cands:
        cands = [Bp0]
    # v7x megacore: when N gives only one tile, keep >= 2 parallel B tiles.
    if n_tiles_n == 1 and Bp0 >= 256:
        pref = [t for t in cands if pl.cdiv(Bp0, t) >= 2]
        if pref:
            cands = pref

    def fits_single_k(tb):
        x_bytes = 2 * tb * Kp * in_itemsize        # double-buffered activations
        w_bytes = 2 * Kp * tn * in_itemsize        # resident weight slab
        o_bytes = 2 * tb * tn * out_itemsize
        b_bytes = 2 * tn * 4
        return x_bytes + w_bytes + o_bytes + b_bytes <= _VMEM_BUDGET

    for tb in cands:
        if fits_single_k(tb):
            return tb, tn, Kp                      # fused single-K path

    # Fallback: K-tiled reduction (only when dim_in is huge).
    tk = 512 if Kp % 512 == 0 else (256 if Kp % 256 == 0 else 128)

    def fits_ktiled(tb):
        x_bytes = 2 * tb * tk * in_itemsize
        w_bytes = 2 * tk * tn * in_itemsize
        o_bytes = 2 * tb * tn * out_itemsize
        acc_bytes = tb * tn * 4
        return x_bytes + w_bytes + o_bytes + acc_bytes + 2 * tn * 4 <= _VMEM_BUDGET

    for tb in cands:
        if fits_ktiled(tb):
            return tb, tn, tk
    return cands[-1], tn, 128


# --------------------------- forward ------------------------------------------

def ava_model_forward(x, w, b, *, compute_dtype=None):
    """Forward of AVAModel / SlowFastHead:  y = x @ w.T + b.

    x: (B, dim_in)        activations
    w: (dim_out, dim_in)  PyTorch nn.Linear weight layout
    b: (dim_out,)         bias
    compute_dtype: optional dtype for the matmul operands (e.g. jnp.bfloat16);
                   accumulation and bias add stay in f32. Output keeps x.dtype.
    """
    B, dim_in = x.shape
    dim_out, dim_in_w = w.shape
    assert dim_in_w == dim_in, "weight shape mismatch"

    in_dtype = jnp.dtype(compute_dtype) if compute_dtype is not None else x.dtype
    out_dtype = x.dtype

    Kp = _round_up(dim_in, 128)                 # lane-dense contraction dim
    Np = _round_up(dim_out, 128)                # lane-dense output dim

    tile_b, tn, tk = _select_tiles(B, Kp, Np, in_dtype.itemsize,
                                   out_dtype.itemsize)
    Bp = _round_up(B, tile_b)

    # ---- Operand prep; pads are skipped when already aligned ---------------
    xp = x.astype(in_dtype)
    if (Bp, Kp) != (B, dim_in):
        xp = jnp.pad(xp, ((0, Bp - B), (0, Kp - dim_in)))
    w_t = w.T.astype(in_dtype)                  # (dim_in, dim_out)
    if (Kp, Np) != (dim_in, dim_out):
        w_t = jnp.pad(w_t, ((0, Kp - dim_in), (0, Np - dim_out)))
    bp = b.reshape(1, dim_out).astype(jnp.float32)
    if Np != dim_out:
        bp = jnp.pad(bp, ((0, 0), (0, Np - dim_out)))

    bytes_accessed = (xp.size * xp.dtype.itemsize
                      + w_t.size * w_t.dtype.itemsize
                      + bp.size * bp.dtype.itemsize
                      + Bp * Np * out_dtype.itemsize)
    cost = pl.CostEstimate(flops=2 * Bp * Kp * Np, transcendentals=0,
                           bytes_accessed=bytes_accessed)

    if tk == Kp:
        # Fused path: 2-D parallel grid, resident weight, no scratch.
        out_padded = pl.pallas_call(
            _linear_kernel_fused,
            out_shape=jax.ShapeDtypeStruct((Bp, Np), out_dtype),
            grid=(Bp // tile_b, Np // tn),
            in_specs=[
                pl.BlockSpec((tile_b, Kp), lambda i, j: (i, 0)),   # x
                pl.BlockSpec((Kp, tn), lambda i, j: (0, j)),       # w_t (resident)
                pl.BlockSpec((1, tn), lambda i, j: (0, j)),        # bias
            ],
            out_specs=pl.BlockSpec((tile_b, tn), lambda i, j: (i, j)),
            compiler_params=pltpu.CompilerParams(
                dimension_semantics=("parallel", "parallel"),
                vmem_limit_bytes=_VMEM_LIMIT),
            cost_estimate=cost,
        )(xp, w_t, bp)
    else:
        # Fallback: K-tiled reduction with f32 accumulator.
        out_padded = pl.pallas_call(
            _linear_kernel_ktiled,
            out_shape=jax.ShapeDtypeStruct((Bp, Np), out_dtype),
            grid=(Bp // tile_b, Np // tn, Kp // tk),
            in_specs=[
                pl.BlockSpec((tile_b, tk), lambda i, j, k: (i, k)),   # x
                pl.BlockSpec((tk, tn), lambda i, j, k: (k, j)),       # w_t
                pl.BlockSpec((1, tn), lambda i, j, k: (0, j)),        # bias
            ],
            out_specs=pl.BlockSpec((tile_b, tn), lambda i, j, k: (i, j)),
            scratch_shapes=[pltpu.VMEM((tile_b, tn), jnp.float32)],
            compiler_params=pltpu.CompilerParams(
                dimension_semantics=("parallel", "parallel", "arbitrary"),
                vmem_limit_bytes=_VMEM_LIMIT),
            cost_estimate=cost,
        )(xp, w_t, bp)

    if (Bp, Np) != (B, dim_out):
        out_padded = out_padded[:B, :dim_out]
    return out_padded


if __name__ == "__main__":
    key = jax.random.PRNGKey(0)

    # --- Case 1: small shapes consistent with AVAModel(dim_in, dim_out) -----
    B, dim_in, dim_out = 8, 32, 16
    k_x, k_w, k_b = jax.random.split(key, 3)
    # PyTorch nn.Linear layout: weight (dim_out, dim_in), bias (dim_out,)
    w = jax.random.normal(k_w, (dim_out, dim_in), dtype=jnp.float32) * 0.1
    b = jax.random.normal(k_b, (dim_out,), dtype=jnp.float32) * 0.1
    x = jax.random.normal(k_x, (B, dim_in), dtype=jnp.float32)

    y = jax.block_until_ready(ava_model_forward(x, w, b))
    y_ref = x @ w.T + b
    assert y.shape == (B, dim_out)
    assert jnp.allclose(y, y_ref, atol=1e-5, rtol=1e-5), "mismatch vs reference"

    # --- Case 2: ragged B/K/N exercising padding + multi-B-tile grid --------
    B2, din2, dout2 = 300, 96, 80
    k_x2, k_w2, k_b2 = jax.random.split(jax.random.PRNGKey(1), 3)
    w2 = jax.random.normal(k_w2, (dout2, din2), dtype=jnp.float32) * 0.1
    b2 = jax.random.normal(k_b2, (dout2,), dtype=jnp.float32) * 0.1
    x2 = jax.random.normal(k_x2, (B2, din2), dtype=jnp.float32)
    y2 = jax.block_until_ready(ava_model_forward(x2, w2, b2))
    y2_ref = x2 @ w2.T + b2
    assert y2.shape == (B2, dout2)
    assert jnp.allclose(y2, y2_ref, atol=1e-3, rtol=1e-3), "ragged mismatch"

    # --- Case 3: optional bf16 compute path (mem-bound speedup) -------------
    y3 = jax.block_until_ready(
        ava_model_forward(x, w, b, compute_dtype=jnp.bfloat16))
    assert y3.shape == (B, dim_out)
    assert jnp.allclose(y3.astype(jnp.float32), y_ref, atol=5e-2, rtol=5e-2), \
        "bf16 path mismatch"

    print("KERNEL_OK")
</pallas_src>

<mosaic_0001>
module attributes {stable_mosaic.version = 11 : i64} {
  func.func @_linear_kernel_fused(%arg0: i32, %arg1: i32, %arg2: memref<8x128xf32, #tpu.memory_space<vmem>>, %arg3: memref<128x128xf32, #tpu.memory_space<vmem>>, %arg4: memref<1x128xf32, #tpu.memory_space<vmem>>, %arg5: memref<8x128xf32, #tpu.memory_space<vmem>>) attributes {dimension_semantics = [#tpu.dimension_semantics<parallel>, #tpu.dimension_semantics<parallel>], iteration_bounds = array<i64: 1, 1>, scalar_prefetch = 0 : i64, scratch_operands = 0 : i64, tpu.core_type = #tpu.core_type<tc>, window_params = [{transform_indices = @transform_0, window_bounds = array<i64: 8, 128>}, {transform_indices = @transform_1, window_bounds = array<i64: 128, 128>}, {transform_indices = @transform_2, window_bounds = array<i64: 1, 128>}, {transform_indices = @transform_3, window_bounds = array<i64: 8, 128>}]} {
    %c0 = arith.constant 0 : index
    %c0_0 = arith.constant 0 : index
    %0 = vector.load %arg2[%c0, %c0_0] : memref<8x128xf32, #tpu.memory_space<vmem>>, vector<8x128xf32>
    %c0_1 = arith.constant 0 : index
    %c0_2 = arith.constant 0 : index
    %1 = vector.load %arg3[%c0_1, %c0_2] : memref<128x128xf32, #tpu.memory_space<vmem>>, vector<128x128xf32>
    %cst = arith.constant dense<0.000000e+00> : vector<8x128xf32>
    %2 = tpu.matmul %0, %1, %cst {dimension_numbers = #tpu.dot_dimension_numbers<[1], [0], [0], [1], [0, 0, 1, 1], [], []>} : vector<8x128xf32>, vector<128x128xf32>, vector<8x128xf32> -> vector<8x128xf32>
    %c0_3 = arith.constant 0 : index
    %c0_4 = arith.constant 0 : index
    %3 = vector.load %arg4[%c0_3, %c0_4] : memref<1x128xf32, #tpu.memory_space<vmem>>, vector<1x128xf32>
    %4 = vector.broadcast %3 : vector<1x128xf32> to vector<8x128xf32>
    %5 = arith.addf %2, %4 : vector<8x128xf32>
    %c0_5 = arith.constant 0 : index
    %c0_6 = arith.constant 0 : index
    %6 = vector.load %arg5[%c0_5, %c0_6] : memref<8x128xf32, #tpu.memory_space<vmem>>, vector<8x128xf32>
    tpu.vector_store %arg5[%c0_5, %c0_6], %5 {strides = array<i32>} : memref<8x128xf32, #tpu.memory_space<vmem>>, vector<8x128xf32>,
    return
  }
  func.func @transform_0(%arg0: i32, %arg1: i32) -> (i32, i32) {
    %c0_i32 = arith.constant 0 : i32
    %c0_i32_0 = arith.constant 0 : i32
    return %arg0, %c0_i32 : i32, i32
  }
  func.func @transform_1(%arg0: i32, %arg1: i32) -> (i32, i32) {
    %c0_i32 = arith.constant 0 : i32
    %c0_i32_0 = arith.constant 0 : i32
    return %c0_i32, %arg1 : i32, i32
  }
  func.func @transform_2(%arg0: i32, %arg1: i32) -> (i32, i32) {
    %c0_i32 = arith.constant 0 : i32
    %c0_i32_0 = arith.constant 0 : i32
    return %c0_i32, %arg1 : i32, i32
  }
  func.func @transform_3(%arg0: i32, %arg1: i32) -> (i32, i32) {
    %c0_i32 = arith.constant 0 : i32
    return %arg0, %arg1 : i32, i32
  }
}

</mosaic_0001>

<bundles_post_ra>
// kernel: tpu_custom_call.1
= control target key start
LH: loop header
LB: loop body
LE: loop exit
PB: predicated region body
PF: predicated region fallthrough
CT: control target
= control target key end

     0   :  { %8 = vsyncpa [#allocation3], 0  ;;  %s383_s0 = inlined_call_operand.hbm [shape: f32[8,128], index: 0, kind: input, shape index: {}]   ;;  %s384_s1 = inlined_call_operand.hbm [shape: f32[128,128], index: 1, kind: input, shape index: {}]   ;;  %s385_s2 = inlined_call_operand.vmem [shape: f32[1,128], index: 2, kind: input, shape index: {}]   ;;  %s386_s3 = inlined_call_operand.hbm [shape: f32[8,128], index: 3, kind: output, shape index: {}]  }
   0x1   :  { %9 = vsyncpa [#allocation6], 0 }
   0x2   :  { %10 = vsyncpa [#allocation4], 0  ;;  %s309_s12 = smov [#allocation2]   ;;  %s310_s14 = smov [#allocation5]  }
   0x3   :  { %s17_s13 = sshll.u32 %s309_s12, 4  ;;  %s26_s15 = sshll.u32 %s310_s14, 4  ;;  %s18_s13 = int_to_ptr.vmem [resolvable:$true] %s17_s13  ;;  %s337_s15 = int_to_ptr.vmem [resolvable:$true] %s26_s15 }
   0x4   :  { %s237_s18 = scalar_lea.hbm %s383_s0, 128 }
   0x5   :  { %p238_p0 = scmp.ne.s32.totalorder %s383_s0, %s237_s18  ;;  %p241_p1 = scmp.lt.u32.totalorder %s237_s18, %s383_s0 }
   0x7   :  { %p243_p2 = pnand %p241_p1, %p238_p0 }
   0x9   :  { %246 = shalt.err (!%p243_p2)
}
   0xa   :  { %s247_s23 = scalar_lea.vmem %s18_s13, 128  ;;  %p252_p4 = scmp.lt.s32.totalorder %s18_s13, %s18_s13 }
   0xb   :  { %p248_p3 = scmp.ne.s32.totalorder %s18_s13, %s247_s23  ;;  %p253_p5 = scmp.lt.s32.totalorder %s247_s23, %s247_s23 }
   0xd   :  { %p254_p6 = por %p253_p5, %p252_p4 }
   0xf   :  { %p255_p7 = pnand %p254_p6, %p248_p3 }
  0x11   :  { %258 = shalt.err (!%p255_p7)
}
  0x12   :  { %20 = dma.hbm_to_vmem [thread:$0]  %s383_s0, 128, %s18_s13, [#allocation3]  }
  0x13   :  { %s259_s28 = scalar_lea.hbm %s384_s1, 2048 }
  0x14   :  { %p260_p8 = scmp.ne.s32.totalorder %s384_s1, %s259_s28  ;;  %p263_p9 = scmp.lt.u32.totalorder %s259_s28, %s384_s1 }
  0x16   :  { %p265_p10 = pnand %p263_p9, %p260_p8 }
  0x18   :  { %268 = shalt.err (!%p265_p10)
}
  0x19   :  { %s269_s6 = scalar_lea.vmem %s337_s15, 2048  ;;  %p274_p12 = scmp.lt.s32.totalorder %s337_s15, %s337_s15 }
  0x1a   :  { %p270_p11 = scmp.ne.s32.totalorder %s337_s15, %s269_s6  ;;  %p275_p13 = scmp.lt.s32.totalorder %s269_s6, %s269_s6 }
  0x1c   :  { %p276_p0 = por %p275_p13, %p274_p12 }
  0x1e   :  { %p277_p1 = pnand %p276_p0, %p270_p11 }
  0x20   :  { %280 = shalt.err (!%p277_p1)
}
  0x21   :  { %s311_s0 = smov 128   ;;  %s312_s7 = smov 8  }
  0x22   :  { %32 = dma.hbm_to_vmem [thread:$0]  %s384_s1, 2048, %s337_s15, [#allocation6], %s311_s0, %s311_s0, %s312_s7  }
  0x23   :  { %303 = dma.done.wait [#allocation3], 128  }
  0x24   :  { %304 = vsyncadd [#allocation3], 4294967168 }
  0x25   :  { %305 = dma.done.wait [#allocation6], 2048  }
  0x26   :  { %306 = vsyncadd [#allocation6], 4294965248  ;;  %v313_v0 = vmov 0.0|0.0   ;;  %vm314_vm0 = vmmov 0   ;;  %v315_v1 = vmov 0.0   ;;  %v42_v2 = vld [vmem:[#allocation5] sm:$0xff] }
  0x27   :  { %205 = vmatprep.subr.bf16.mxu0 %v313_v0  ;;  %202 = vmatprep.mubr.msk.f32.mxu0 %vm314_vm0, %v315_v1  ;;  %v43_v3 = vld [vmem:[#allocation5 + $0x8] sm:$0xff]  ;;  %v44_v4 = vld [vmem:[#allocation5 + $0x10] sm:$0xff]  ;;  %v45_v6 = vld [vmem:[#allocation5 + $0x18] sm:$0xff]  ;;  %s316_s11 = smov [#allocation7]  }
  0x28   :  { %v206_v5 = vpack.c.bf16 %v43_v3, %v42_v2  ;;  %v209_v7 = vpack.c.bf16 %v45_v6, %v44_v4  ;;  %v46_v8 = vld [vmem:[#allocation5 + $0x20] sm:$0xff]  ;;  %v47_v9 = vld [vmem:[#allocation5 + $0x28] sm:$0xff]  ;;  %v48_v11 = vld [vmem:[#allocation5 + $0x30] sm:$0xff]  ;;  %s142_s12 = sshll.u32 %s316_s11, 4  ;;  %s143_s12 = int_to_ptr.vmem [resolvable:$true] %s142_s12 }
  0x29   :  { %v212_v10 = vpack.c.bf16 %v47_v9, %v46_v8  ;;  %v49_v12 = vld [vmem:[#allocation5 + $0x38] sm:$0xff]  ;;  %v50_v14 = vld [vmem:[#allocation5 + $0x40] sm:$0xff]  ;;  %v51_v15 = vld [vmem:[#allocation5 + $0x48] sm:$0xff]  ;;  %s281_s13 = scalar_lea.vmem %s143_s12, 128  ;;  %p286_p3 = scmp.lt.s32.totalorder %s143_s12, %s143_s12 }
  0x2a   :  { %207 = vmatpush3.bf16.msra.mxu0 %v206_v5  ;;  %v215_v13 = vpack.c.bf16 %v49_v12, %v48_v11  ;;  %v218_v16 = vpack.c.bf16 %v51_v15, %v50_v14  ;;  %v52_v17 = vld [vmem:[#allocation5 + $0x50] sm:$0xff]  ;;  %v53_v18 = vld [vmem:[#allocation5 + $0x58] sm:$0xff]  ;;  %v54_v20 = vld [vmem:[#allocation5 + $0x60] sm:$0xff]  ;;  %p282_p2 = scmp.ne.s32.totalorder %s143_s12, %s281_s13  ;;  %p287_p4 = scmp.lt.s32.totalorder %s281_s13, %s281_s13 }
  0x2b   :  { %208 = vmatprep.subr.bf16.mxu0 %v313_v0  ;;  %v221_v19 = vpack.c.bf16 %v53_v18, %v52_v17  ;;  %v55_v21 = vld [vmem:[#allocation5 + $0x68] sm:$0xff]  ;;  %v56_v23 = vld [vmem:[#allocation5 + $0x70] sm:$0xff]  ;;  %v57_v24 = vld [vmem:[#allocation5 + $0x78] sm:$0xff] }
  0x2c   :  { %v224_v22 = vpack.c.bf16 %v55_v21, %v54_v20  ;;  %v227_v25 = vpack.c.bf16 %v57_v24, %v56_v23  ;;  %v41_v26 = vld [vmem:[#allocation2] sm:$0xff]  ;;  %p288_p5 = por %p287_p4, %p286_p3 }
  0x2d   :  { %v152_v27 = vld [vmem:[%s385_s2] ss:$0 sm:$0xff] }
  0x2e   :  { %210 = vmatpush3.bf16.msra.mxu0 %v209_v7  ;;  %p289_p6 = pnand %p288_p5, %p282_p2 }
  0x2f   :  { %211 = vmatprep.subr.bf16.mxu0 %v313_v0 }
  0x32   :  { %213 = vmatpush3.bf16.msra.mxu0 %v212_v10 }
  0x33   :  { %214 = vmatprep.subr.bf16.mxu0 %v313_v0 }
  0x36   :  { %216 = vmatpush3.bf16.msra.mxu0 %v215_v13 }
  0x37   :  { %217 = vmatprep.subr.bf16.mxu0 %v313_v0 }
  0x3a   :  { %219 = vmatpush3.bf16.msra.mxu0 %v218_v16 }
  0x3b   :  { %220 = vmatprep.subr.bf16.mxu0 %v313_v0 }
  0x3e   :  { %222 = vmatpush3.bf16.msra.mxu0 %v221_v19 }
  0x3f   :  { %223 = vmatprep.subr.bf16.mxu0 %v313_v0 }
  0x42   :  { %225 = vmatpush3.bf16.msra.mxu0 %v224_v22 }
  0x43   :  { %226 = vmatprep.subr.bf16.mxu0 %v313_v0 }
  0x46   :  { %228 = vmatpush3.bf16.msra.mxu0 %v227_v25 }
  0x49   :  { %203 = vmatmul.mubr.f32.vlgmr.msra.gmra.mrb[0].mxu0 %v41_v26 }
 0x11c   :  { %v131_v28 = vpop.f32.mrb[0].mxu0 }
 0x11d   :  { %v132_v29 = vadd.f32 %v152_v27, %v131_v28  ;;  %v204_v30 = vpop.f32.mrb[1].mxu0 }
 0x11f   :  { %135 = vst [vmem:[#allocation7] sm:$0xff] %v132_v29 }
 0x120   :  { %292 = shalt.err (!%p289_p6)
}
 0x121   :  { %s293_s16 = scalar_lea.hbm %s386_s3, 128 }
 0x122   :  { %p294_p7 = scmp.ne.s32.totalorder %s386_s3, %s293_s16  ;;  %p297_p8 = scmp.lt.u32.totalorder %s293_s16, %s386_s3 }
 0x124   :  { %p299_p9 = pnand %p297_p8, %p294_p7 }
 0x126   :  { %302 = shalt.err (!%p299_p9)
}
 0x127   :  { %145 = dma.vmem_to_hbm [thread:$0]  %s143_s12, 128, %s386_s3, [#allocation4]  }
 0x128   :  { %307 = dma.done.wait [#allocation4], 128  }
 0x129   :  { %308 = vsyncadd [#allocation4], 4294967168 }
 0x12a   :  { %149 = vsyncpa [#allocation3], 1 }
 0x12b   :  { %150 = vsyncpa [#allocation6], 1 }
 0x12c   :  { %151 = vsyncpa [#allocation4], 1 }

</bundles_post_ra>
